<compile_context>
chip_gen: v6e
topology: v6e:2x2x1
jax: 0.10.0
libtpu: 0.0.40
codegen_flags: <defaults>
</compile_context>

<pallas_src>
import jax
import jax.numpy as jnp
from jax.experimental import pallas as pl
from jax.experimental.pallas import tpu as pltpu

# Make the pure-JAX reference matmuls f32-accurate so the 1e-4 check below is
# meaningful on TPU (kernel matmuls accumulate in f32 on the MXU).
jax.config.update("jax_default_matmul_precision", "highest")


def _round_up(n, m):
    return ((n + m - 1) // m) * m


def rnn_kernel(x_ref, w_in_ref, w_out_ref, out_ref):
    # x_ref:     (B, T, I)                       input sequence, batch_first
    # w_in_ref:  (I_pad + H_pad + 8, H)          [W_ih^T @0 ; W_hh^T @I_pad ; b @I_pad+H_pad]
    # w_out_ref: (H_pad + 8, O)                  [W_fc^T @0 ; b_fc @H_pad]
    # out_ref:   (B, O)
    B, T, I = x_ref.shape
    H = w_in_ref.shape[1]
    I_pad = _round_up(I, 8)
    H_pad = _round_up(H, 8)

    # Parameter loads: every slice starts at an 8-aligned sublane offset,
    # and each is loaded exactly once (outside the recurrence).
    w_ih = w_in_ref[0:I, :]                                   # (I, H)
    w_hh = w_in_ref[I_pad:I_pad + H, :]                       # (H, H)
    b = w_in_ref[I_pad + H_pad:I_pad + H_pad + 1, :]          # (1, H)

    # 1) One input-projection matmul for ALL timesteps; bias broadcast once.
    #    Result stays in registers (~2 vregs after (8,128) padding).
    x2d = x_ref[...].reshape(B * T, I)                        # rows ordered (b, t)
    xproj = (jnp.dot(x2d, w_ih, preferred_element_type=jnp.float32) + b
             ).reshape(B, T, H)                               # (B, T, H)

    # 2) Serial recurrence, fully unrolled (T small & static): only
    #    h @ W_hh + add + tanh sit on the latency-critical chain.
    #    For large T, switch to lax.fori_loop / a time-chunked grid axis.
    h = jnp.zeros((B, H), jnp.float32)
    for t in range(T):  # t is a Python int -> static slices
        h = jnp.tanh(
            jnp.dot(h, w_hh, preferred_element_type=jnp.float32)
            + xproj[:, t, :])

    # 3) Final Linear on the last hidden state (fc(out[:, -1, :])).
    w_fc = w_out_ref[0:H, :]                                  # (H, O)
    b_fc = w_out_ref[H_pad:H_pad + 1, :]                      # (1, O)
    out_ref[...] = (
        jnp.dot(h, w_fc, preferred_element_type=jnp.float32) + b_fc
    ).astype(out_ref.dtype)


def rnn_forward(x_bti, w_ih, w_hh, b_ih, b_hh, w_fc, b_fc):
    """x_bti: (B, T, I) float32, PyTorch batch_first layout. Returns (B, O)."""
    B, T, I = x_bti.shape
    H = w_hh.shape[0]
    O = w_fc.shape[0]
    I_pad = _round_up(I, 8)
    H_pad = _round_up(H, 8)

    # Pack the six tiny parameters into two slabs (3 input DMAs total).
    # Sections start on 8-row boundaries so in-kernel slices are aligned.
    w_in = jnp.zeros((I_pad + H_pad + 8, H), jnp.float32)
    w_in = w_in.at[0:I, :].set(w_ih.T)                        # W_ih^T
    w_in = w_in.at[I_pad:I_pad + H, :].set(w_hh.T)            # W_hh^T
    w_in = w_in.at[I_pad + H_pad, :].set(b_ih + b_hh)         # combined bias

    w_out = jnp.zeros((H_pad + 8, O), jnp.float32)
    w_out = w_out.at[0:H, :].set(w_fc.T)                      # W_fc^T
    w_out = w_out.at[H_pad, :].set(b_fc)                      # fc bias

    return pl.pallas_call(
        rnn_kernel,
        out_shape=jax.ShapeDtypeStruct((B, O), jnp.float32),
        in_specs=[
            pl.BlockSpec(memory_space=pltpu.MemorySpace.VMEM),   # x (B,T,I)
            pl.BlockSpec(memory_space=pltpu.MemorySpace.VMEM),   # packed RNN weights
            pl.BlockSpec(memory_space=pltpu.MemorySpace.VMEM),   # packed FC weights
        ],
        out_specs=pl.BlockSpec(memory_space=pltpu.MemorySpace.VMEM),
    )(x_bti, w_in, w_out)


def rnn_reference(x, w_ih, w_hh, b_ih, b_hh, w_fc, b_fc):
    """Pure-JAX reference matching nn.RNN(batch_first=True) + Linear."""
    B, T, I = x.shape
    H = w_hh.shape[0]
    h = jnp.zeros((B, H), jnp.float32)

    def step(h, x_t):
        h = jnp.tanh(x_t @ w_ih.T + b_ih + h @ w_hh.T + b_hh)
        return h, None

    h_last, _ = jax.lax.scan(step, h, jnp.transpose(x, (1, 0, 2)))
    return h_last @ w_fc.T + b_fc


if __name__ == "__main__":
    # Shapes implied by the module: input_size=10, hidden_size=20, output_size=10.
    B, T, I, H, O = 2, 8, 10, 20, 10

    key = jax.random.PRNGKey(0)
    kx, k1, k2, k3, k4, k5, k6 = jax.random.split(key, 7)

    # PyTorch-style uniform(-1/sqrt(H), 1/sqrt(H)) init.
    bound = 1.0 / jnp.sqrt(jnp.float32(H))
    w_ih = jax.random.uniform(k1, (H, I), jnp.float32, -bound, bound)
    w_hh = jax.random.uniform(k2, (H, H), jnp.float32, -bound, bound)
    b_ih = jax.random.uniform(k3, (H,), jnp.float32, -bound, bound)
    b_hh = jax.random.uniform(k4, (H,), jnp.float32, -bound, bound)
    w_fc = jax.random.uniform(k5, (O, H), jnp.float32, -bound, bound)
    b_fc = jax.random.uniform(k6, (O,), jnp.float32, -bound, bound)

    x = jax.random.normal(kx, (B, T, I), jnp.float32)

    out = rnn_forward(x, w_ih, w_hh, b_ih, b_hh, w_fc, b_fc)
    out = jax.block_until_ready(out)

    ref = rnn_reference(x, w_ih, w_hh, b_ih, b_hh, w_fc, b_fc)
    assert out.shape == (B, O)
    assert jnp.allclose(out, ref, atol=1e-4, rtol=1e-4), "mismatch vs reference"

    print("KERNEL_OK")
</pallas_src>

<mosaic_0001>
module attributes {stable_mosaic.version = 11 : i64} {
  func.func @rnn_kernel(%arg0: memref<2x8x10xf32, #tpu.memory_space<vmem>>, %arg1: memref<48x20xf32, #tpu.memory_space<vmem>>, %arg2: memref<32x10xf32, #tpu.memory_space<vmem>>, %arg3: memref<2x10xf32, #tpu.memory_space<vmem>>) attributes {dimension_semantics = [], scalar_prefetch = 0 : i64, scratch_operands = 0 : i64, tpu.core_type = #tpu.core_type<tc>} {
    %c0 = arith.constant 0 : index
    %c0_0 = arith.constant 0 : index
    %0 = vector.load %arg1[%c0, %c0_0] : memref<48x20xf32, #tpu.memory_space<vmem>>, vector<10x20xf32>
    %c16 = arith.constant 16 : index
    %c0_1 = arith.constant 0 : index
    %1 = vector.load %arg1[%c16, %c0_1] : memref<48x20xf32, #tpu.memory_space<vmem>>, vector<20x20xf32>
    %c40 = arith.constant 40 : index
    %c0_2 = arith.constant 0 : index
    %2 = vector.load %arg1[%c40, %c0_2] : memref<48x20xf32, #tpu.memory_space<vmem>>, vector<1x20xf32>
    %c0_3 = arith.constant 0 : index
    %c0_4 = arith.constant 0 : index
    %c0_5 = arith.constant 0 : index
    %3 = vector.load %arg0[%c0_3, %c0_4, %c0_5] : memref<2x8x10xf32, #tpu.memory_space<vmem>>, vector<2x8x10xf32>
    %4 = vector.shape_cast %3 : vector<2x8x10xf32> to vector<16x10xf32>
    %cst = arith.constant dense<0.000000e+00> : vector<16x20xf32>
    %5 = tpu.matmul %4, %0, %cst {dimension_numbers = #tpu.dot_dimension_numbers<[1], [0], [0], [1], [0, 0, 1, 1], [], []>, precision = #tpu.contract_precision<fp32>} : vector<16x10xf32>, vector<10x20xf32>, vector<16x20xf32> -> vector<16x20xf32>
    %6 = vector.broadcast %2 : vector<1x20xf32> to vector<16x20xf32>
    %7 = arith.addf %5, %6 : vector<16x20xf32>
    %8 = vector.shape_cast %7 : vector<16x20xf32> to vector<2x8x20xf32>
    %cst_6 = arith.constant 0.000000e+00 : f32
    %9 = vector.broadcast %cst_6 : f32 to vector<2x20xf32>
    %cst_7 = arith.constant dense<0.000000e+00> : vector<2x20xf32>
    %10 = tpu.matmul %9, %1, %cst_7 {dimension_numbers = #tpu.dot_dimension_numbers<[1], [0], [0], [1], [0, 0, 1, 1], [], []>, precision = #tpu.contract_precision<fp32>} : vector<2x20xf32>, vector<20x20xf32>, vector<2x20xf32> -> vector<2x20xf32>
    %11 = vector.extract_strided_slice %8 {offsets = [0, 0, 0], sizes = [2, 1, 20], strides = [1, 1, 1]} : vector<2x8x20xf32> to vector<2x1x20xf32>
    %12 = vector.shape_cast %11 : vector<2x1x20xf32> to vector<2x20xf32>
    %13 = arith.addf %10, %12 : vector<2x20xf32>
    %14 = math.tanh %13 : vector<2x20xf32>
    %cst_8 = arith.constant dense<0.000000e+00> : vector<2x20xf32>
    %15 = tpu.matmul %14, %1, %cst_8 {dimension_numbers = #tpu.dot_dimension_numbers<[1], [0], [0], [1], [0, 0, 1, 1], [], []>, precision = #tpu.contract_precision<fp32>} : vector<2x20xf32>, vector<20x20xf32>, vector<2x20xf32> -> vector<2x20xf32>
    %16 = vector.extract_strided_slice %8 {offsets = [0, 1, 0], sizes = [2, 1, 20], strides = [1, 1, 1]} : vector<2x8x20xf32> to vector<2x1x20xf32>
    %17 = vector.shape_cast %16 : vector<2x1x20xf32> to vector<2x20xf32>
    %18 = arith.addf %15, %17 : vector<2x20xf32>
    %19 = math.tanh %18 : vector<2x20xf32>
    %cst_9 = arith.constant dense<0.000000e+00> : vector<2x20xf32>
    %20 = tpu.matmul %19, %1, %cst_9 {dimension_numbers = #tpu.dot_dimension_numbers<[1], [0], [0], [1], [0, 0, 1, 1], [], []>, precision = #tpu.contract_precision<fp32>} : vector<2x20xf32>, vector<20x20xf32>, vector<2x20xf32> -> vector<2x20xf32>
    %21 = vector.extract_strided_slice %8 {offsets = [0, 2, 0], sizes = [2, 1, 20], strides = [1, 1, 1]} : vector<2x8x20xf32> to vector<2x1x20xf32>
    %22 = vector.shape_cast %21 : vector<2x1x20xf32> to vector<2x20xf32>
    %23 = arith.addf %20, %22 : vector<2x20xf32>
    %24 = math.tanh %23 : vector<2x20xf32>
    %cst_10 = arith.constant dense<0.000000e+00> : vector<2x20xf32>
    %25 = tpu.matmul %24, %1, %cst_10 {dimension_numbers = #tpu.dot_dimension_numbers<[1], [0], [0], [1], [0, 0, 1, 1], [], []>, precision = #tpu.contract_precision<fp32>} : vector<2x20xf32>, vector<20x20xf32>, vector<2x20xf32> -> vector<2x20xf32>
    %26 = vector.extract_strided_slice %8 {offsets = [0, 3, 0], sizes = [2, 1, 20], strides = [1, 1, 1]} : vector<2x8x20xf32> to vector<2x1x20xf32>
    %27 = vector.shape_cast %26 : vector<2x1x20xf32> to vector<2x20xf32>
    %28 = arith.addf %25, %27 : vector<2x20xf32>
    %29 = math.tanh %28 : vector<2x20xf32>
    %cst_11 = arith.constant dense<0.000000e+00> : vector<2x20xf32>
    %30 = tpu.matmul %29, %1, %cst_11 {dimension_numbers = #tpu.dot_dimension_numbers<[1], [0], [0], [1], [0, 0, 1, 1], [], []>, precision = #tpu.contract_precision<fp32>} : vector<2x20xf32>, vector<20x20xf32>, vector<2x20xf32> -> vector<2x20xf32>
    %31 = vector.extract_strided_slice %8 {offsets = [0, 4, 0], sizes = [2, 1, 20], strides = [1, 1, 1]} : vector<2x8x20xf32> to vector<2x1x20xf32>
    %32 = vector.shape_cast %31 : vector<2x1x20xf32> to vector<2x20xf32>
    %33 = arith.addf %30, %32 : vector<2x20xf32>
    %34 = math.tanh %33 : vector<2x20xf32>
    %cst_12 = arith.constant dense<0.000000e+00> : vector<2x20xf32>
    %35 = tpu.matmul %34, %1, %cst_12 {dimension_numbers = #tpu.dot_dimension_numbers<[1], [0], [0], [1], [0, 0, 1, 1], [], []>, precision = #tpu.contract_precision<fp32>} : vector<2x20xf32>, vector<20x20xf32>, vector<2x20xf32> -> vector<2x20xf32>
    %36 = vector.extract_strided_slice %8 {offsets = [0, 5, 0], sizes = [2, 1, 20], strides = [1, 1, 1]} : vector<2x8x20xf32> to vector<2x1x20xf32>
    %37 = vector.shape_cast %36 : vector<2x1x20xf32> to vector<2x20xf32>
    %38 = arith.addf %35, %37 : vector<2x20xf32>
    %39 = math.tanh %38 : vector<2x20xf32>
    %cst_13 = arith.constant dense<0.000000e+00> : vector<2x20xf32>
    %40 = tpu.matmul %39, %1, %cst_13 {dimension_numbers = #tpu.dot_dimension_numbers<[1], [0], [0], [1], [0, 0, 1, 1], [], []>, precision = #tpu.contract_precision<fp32>} : vector<2x20xf32>, vector<20x20xf32>, vector<2x20xf32> -> vector<2x20xf32>
    %41 = vector.extract_strided_slice %8 {offsets = [0, 6, 0], sizes = [2, 1, 20], strides = [1, 1, 1]} : vector<2x8x20xf32> to vector<2x1x20xf32>
    %42 = vector.shape_cast %41 : vector<2x1x20xf32> to vector<2x20xf32>
    %43 = arith.addf %40, %42 : vector<2x20xf32>
    %44 = math.tanh %43 : vector<2x20xf32>
    %cst_14 = arith.constant dense<0.000000e+00> : vector<2x20xf32>
    %45 = tpu.matmul %44, %1, %cst_14 {dimension_numbers = #tpu.dot_dimension_numbers<[1], [0], [0], [1], [0, 0, 1, 1], [], []>, precision = #tpu.contract_precision<fp32>} : vector<2x20xf32>, vector<20x20xf32>, vector<2x20xf32> -> vector<2x20xf32>
    %46 = vector.extract_strided_slice %8 {offsets = [0, 7, 0], sizes = [2, 1, 20], strides = [1, 1, 1]} : vector<2x8x20xf32> to vector<2x1x20xf32>
    %47 = vector.shape_cast %46 : vector<2x1x20xf32> to vector<2x20xf32>
    %48 = arith.addf %45, %47 : vector<2x20xf32>
    %49 = math.tanh %48 : vector<2x20xf32>
    %c0_15 = arith.constant 0 : index
    %c0_16 = arith.constant 0 : index
    %50 = vector.load %arg2[%c0_15, %c0_16] : memref<32x10xf32, #tpu.memory_space<vmem>>, vector<20x10xf32>
    %c24 = arith.constant 24 : index
    %c0_17 = arith.constant 0 : index
    %51 = vector.load %arg2[%c24, %c0_17] : memref<32x10xf32, #tpu.memory_space<vmem>>, vector<1x10xf32>
    %cst_18 = arith.constant dense<0.000000e+00> : vector<2x10xf32>
    %52 = tpu.matmul %49, %50, %cst_18 {dimension_numbers = #tpu.dot_dimension_numbers<[1], [0], [0], [1], [0, 0, 1, 1], [], []>, precision = #tpu.contract_precision<fp32>} : vector<2x20xf32>, vector<20x10xf32>, vector<2x10xf32> -> vector<2x10xf32>
    %53 = vector.broadcast %51 : vector<1x10xf32> to vector<2x10xf32>
    %54 = arith.addf %52, %53 : vector<2x10xf32>
    %c0_19 = arith.constant 0 : index
    %c0_20 = arith.constant 0 : index
    %55 = vector.load %arg3[%c0_19, %c0_20] : memref<2x10xf32, #tpu.memory_space<vmem>>, vector<2x10xf32>
    tpu.vector_store %arg3[%c0_19, %c0_20], %54 {strides = array<i32>} : memref<2x10xf32, #tpu.memory_space<vmem>>, vector<2x10xf32>,
    return
  }
}

</mosaic_0001>

<bundles_post_ra>
// kernel: tpu_custom_call.1
= control target key start
LH: loop header
LB: loop body
LE: loop exit
PB: predicated region body
PF: predicated region fallthrough
CT: control target
= control target key end

     0   :  { %vm34_vm0 = vcmask 1041408   ;;  %vm27_vm1 = vcmask 80896   ;;  %s6325_s0 = inlined_call_operand.vmem [shape: f32[2,8,10], index: 0, kind: input, shape index: {}]   ;;  %s6326_s1 = inlined_call_operand.vmem [shape: f32[48,20], index: 1, kind: input, shape index: {}]   ;;  %s6327_s2 = inlined_call_operand.vmem [shape: f32[32,10], index: 2, kind: input, shape index: {}]   ;;  %s6328_s3 = inlined_call_operand.hbm [shape: f32[2,10], index: 3, kind: output, shape index: {}]  }
   0x1   :  { %v16_v0 = vld [vmem:[%s6326_s1 + $0x8] sm:$0x3]  ;;  %v15_v1 = vld [vmem:[%s6326_s1] sm:$0xff] }
   0x2   :  { %v21_v2 = vld [vmem:[%s6325_s0] sm:$0xff]  ;;  %v36_v3 = vsel %vm34_vm0, %v16_v0, 0  ;;  %v5731_v4 = vand.u32 4294901760, %v15_v1  ;;  %v22_v5 = vld [vmem:[%s6325_s0 + $0x8] sm:$0xff] }
   0x3   :  { %v29_v6 = vsel %vm27_vm1, %v21_v2, 0  ;;  %v5736_v7 = vand.u32 4294901760, %v36_v3  ;;  %v32_v8 = vsel %vm27_vm1, %v22_v5, 0 }
   0x4   :  { %v5738_v9 = vand.u32 4294901760, %v29_v6  ;;  %v5740_v10 = vand.u32 4294901760, %v32_v8  ;;  %v162_v11 = vsub.f32 %v15_v1, %v5731_v4 }
   0x5   :  { %8 = vsyncpa [#allocation3], 0  ;;  %5130 = vmatprep.subr.mxu0 %v5736_v7  ;;  %v155_v13 = vsub.f32 %v36_v3, %v5736_v7  ;;  %v19_v14 = vld [vmem:[%s6326_s1 + $0x20] sm:$0xf]  ;;  %vm550_vm2 = vcmask 1043456   ;;  %v18_v29 = vld [vmem:[%s6326_s1 + $0x18] sm:$0xff] }
   0x6   :  { %v106_v12 = vsub.f32 %v29_v6, %v5738_v9  ;;  %5141 = vmatprep.mubr.f32.mxu1 %v5738_v9  ;;  %5131 = vmatpush3.msra.mxu0 %v5736_v7  ;;  %v116_v15 = vsub.f32 %v32_v8, %v5740_v10  ;;  %v163_v16 = vand.u32 4294901760, %v162_v11  ;;  %v552_v21 = vsel %vm550_vm2, %v19_v14, 0  ;;  %v17_v31 = vld [vmem:[%s6326_s1 + $0x10] sm:$0xff]  ;;  %v4888_v47 = vld [vmem:[%s6326_s1 + $0x28] ss:$0 sm:$0xff]  ;;  %s5701_s7 = smov [#allocation2]  }
   0x7   :  { %5132 = vmatprep.subr.mxu0 %v5731_v4  ;;  %v156_v18 = vand.u32 4294901760, %v155_v13  ;;  %v5755_v28 = vand.u32 4294901760, %v552_v21  ;;  %v5763_v32 = vand.u32 4294901760, %v18_v29  ;;  %v5768_v34 = vand.u32 4294901760, %v17_v31  ;;  %s4880_s8 = sshll.u32 %s5701_s7, 4  ;;  %s4881_s8 = int_to_ptr.vmem [resolvable:$true] %s4880_s8 }
   0x8   :  { %v107_v17 = vand.u32 4294901760, %v106_v12  ;;  %5133 = vmatpush3.msra.mxu0 %v5731_v4  ;;  %v117_v19 = vand.u32 4294901760, %v116_v15  ;;  %v164_v20 = vsub.f32 %v162_v11, %v163_v16  ;;  %v5699_v41 = vmov 0.0   ;;  %p5682_p1 = scmp.lt.s32.totalorder %s4881_s8, %s4881_s8 }
   0x9   :  { %v157_v23 = vsub.f32 %v155_v13, %v156_v18  ;;  %5144 = vmatprep.subr.mxu0 %v155_v13  ;;  %v5766_v33 = vsub.f32 %v552_v21, %v5755_v28  ;;  %v5773_v35 = vsub.f32 %v18_v29, %v5763_v32  ;;  %v5780_v37 = vsub.f32 %v17_v31, %v5768_v34 }
   0xa   :  { %v108_v22 = vsub.f32 %v106_v12, %v107_v17  ;;  %v118_v24 = vsub.f32 %v116_v15, %v117_v19  ;;  %v165_v27 = vand.u32 4294901760, %v164_v20  ;;  %vm5700_vm3 = vmmov 0  }
   0xb   :  { %v158_v26 = vand.u32 4294901760, %v157_v23  ;;  %v5776_v36 = vand.u32 4294901760, %v5766_v33  ;;  %v5785_v38 = vand.u32 4294901760, %v5773_v35  ;;  %v5792_v40 = vand.u32 4294901760, %v5780_v37 }
   0xc   :  { %v109_v25 = vand.u32 4294901760, %v108_v22  ;;  %v119_v30 = vand.u32 4294901760, %v118_v24  ;;  %vm543_vm4 = vcmask 1041409   ;;  %vm546_vm5 = vcmask 162816  }
   0xd   :  { %5137 = vmatprep.subr.mxu1 %v158_v26  ;;  %v662_v39 = vsub.f32 %v5766_v33, %v5776_v36  ;;  %v669_v42 = vsub.f32 %v5773_v35, %v5785_v38  ;;  %v676_v44 = vsub.f32 %v5780_v37, %v5792_v40  ;;  %vm4872_vm6 = vcmask 74752  }
   0xe   :  { %5134 = vmatprep.mubr.f32.mxu0 %v109_v25  ;;  %5138 = vmatpush3.msra.mxu1 %v158_v26 }
   0xf   :  { %5135 = vmatmul.mubr.f32.vlgmr.msra.gmra.mxu0 %v119_v30  ;;  %5139 = vmatprep.subr.mxu1 %v165_v27  ;;  %v5802_v43 = vand.u32 4294901760, %v662_v39  ;;  %v5812_v45 = vand.u32 4294901760, %v669_v42  ;;  %v5819_v46 = vand.u32 4294901760, %v676_v44 }
  0x10   :  { %5145 = vmatpush3.msra.mxu0 %v155_v13  ;;  %5140 = vmatpush3.msra.mxu1 %v165_v27 }
  0x11   :  { %5146 = vmatprep.subr.mxu0 %v162_v11  ;;  %5142 = vmatmul.mubr.f32.vlgmr.msra.gmra.mxu1 %v5740_v10 }
  0x12   :  { %5147 = vmatpush3.msra.mxu0 %v162_v11  ;;  %5148 = vmatprep.mubr.f32.mxu0 %v106_v12 }
  0x13   :  { %5151 = vmatprep.subr.mxu1 %v5736_v7  ;;  %5158 = vmatprep.subr.mxu0 %v156_v18 }
  0x14   :  { %5149 = vmatmul.mubr.f32.vlgmr.msra.gmra.mxu0 %v116_v15  ;;  %5152 = vmatpush3.msra.mxu1 %v5736_v7 }
  0x15   :  { %5159 = vmatpush3.msra.mxu0 %v156_v18  ;;  %5153 = vmatprep.subr.mxu1 %v5731_v4 }
  0x16   :  { %5160 = vmatprep.subr.mxu0 %v163_v16  ;;  %5154 = vmatpush3.msra.mxu1 %v5731_v4 }
  0x17   :  { %5155 = vmatprep.mubr.f32.mxu1 %v107_v17  ;;  %5161 = vmatpush3.msra.mxu0 %v163_v16 }
  0x18   :  { %5156 = vmatmul.mubr.f32.vlgmr.msra.gmra.mxu1 %v117_v19  ;;  %5162 = vmatprep.mubr.f32.mxu0 %v5738_v9 }
  0x19   :  { %5165 = vmatprep.subr.mxu1 %v5736_v7  ;;  %5172 = vmatprep.subr.mxu0 %v5699_v41 }
  0x1a   :  { %5163 = vmatmul.mubr.f32.vlgmr.msra.gmra.mxu0 %v5740_v10  ;;  %5166 = vmatpush3.msra.mxu1 %v5736_v7 }
  0x1b   :  { %5173 = vmatpush3.msra.mxu0 %v5755_v28  ;;  %5167 = vmatprep.subr.mxu1 %v5731_v4 }
  0x1c   :  { %5174 = vmatprep.subr.mxu0 %v5699_v41  ;;  %5168 = vmatpush3.msra.mxu1 %v5731_v4 }
  0x1d   :  { %5169 = vmatprep.mubr.f32.mxu1 %v5738_v9  ;;  %5175 = vmatpush3.msra.mxu0 %v5763_v32 }
  0x1e   :  { %5170 = vmatmul.mubr.f32.vlgmr.msra.gmra.mxu1 %v5740_v10  ;;  %5176 = vmatprep.subr.mxu0 %v5699_v41 }
  0x1f   :  { %5181 = vmatprep.subr.mxu1 %v5699_v41  ;;  %5177 = vmatpush3.msra.mxu0 %v5768_v34 }
  0x20   :  { %5182 = vmatpush3.msra.mxu1 %v5802_v43  ;;  %5178 = vmatprep.mubr.msk.f32.mxu0 %vm5700_vm3, %v5699_v41 }
  0x21   :  { %5183 = vmatprep.subr.mxu1 %v5699_v41  ;;  %5190 = vmatprep.subr.mxu0 %v5699_v41 }
  0x22   :  { %5179 = vmatmul.mubr.f32.vlgmr.msra.gmra.mxu0 %v5699_v41  ;;  %5184 = vmatpush3.msra.mxu1 %v5812_v45 }
  0x23   :  { %5191 = vmatpush3.msra.mxu0 %v5766_v33  ;;  %5185 = vmatprep.subr.mxu1 %v5699_v41 }
  0x24   :  { %5192 = vmatprep.subr.mxu0 %v5699_v41  ;;  %5186 = vmatpush3.msra.mxu1 %v5819_v46 }
  0x25   :  { %5187 = vmatprep.mubr.msk.f32.mxu1 %vm5700_vm3, %v5699_v41  ;;  %5193 = vmatpush3.msra.mxu0 %v5773_v35 }
  0x26   :  { %5188 = vmatmul.mubr.f32.vlgmr.msra.gmra.mxu1 %v5699_v41  ;;  %5194 = vmatprep.subr.mxu0 %v5699_v41 }
  0x27   :  { %5199 = vmatprep.subr.mxu1 %v5699_v41  ;;  %5195 = vmatpush3.msra.mxu0 %v5780_v37 }
  0x28   :  { %5200 = vmatpush3.msra.mxu1 %v5755_v28  ;;  %5196 = vmatprep.mubr.msk.f32.mxu0 %vm5700_vm3, %v5699_v41 }
  0x29   :  { %5201 = vmatprep.subr.mxu1 %v5699_v41  ;;  %5208 = vmatprep.subr.mxu0 %v5699_v41 }
  0x2a   :  { %5197 = vmatmul.mubr.f32.vlgmr.msra.gmra.mxu0 %v5699_v41  ;;  %5202 = vmatpush3.msra.mxu1 %v5763_v32 }
  0x2b   :  { %5209 = vmatpush3.msra.mxu0 %v5776_v36  ;;  %5203 = vmatprep.subr.mxu1 %v5699_v41 }
  0x2c   :  { %5210 = vmatprep.subr.mxu0 %v5699_v41  ;;  %5204 = vmatpush3.msra.mxu1 %v5768_v34 }
  0x2d   :  { %5205 = vmatprep.mubr.msk.f32.mxu1 %vm5700_vm3, %v5699_v41  ;;  %5211 = vmatpush3.msra.mxu0 %v5785_v38 }
  0x2e   :  { %5206 = vmatmul.mubr.f32.vlgmr.msra.gmra.mxu1 %v5699_v41  ;;  %5212 = vmatprep.subr.mxu0 %v5699_v41 }
  0x2f   :  { %5217 = vmatprep.subr.mxu1 %v5699_v41  ;;  %5213 = vmatpush3.msra.mxu0 %v5792_v40 }
  0x30   :  { %5214 = vmatprep.mubr.msk.f32.mxu0 %vm5700_vm3, %v5699_v41  ;;  %5218 = vmatpush3.msra.mxu1 %v5755_v28 }
  0x31   :  { %5215 = vmatmul.mubr.f32.vlgmr.msra.gmra.mxu0 %v5699_v41  ;;  %5219 = vmatprep.subr.mxu1 %v5699_v41 }
  0x32   :  { %5223 = vmatprep.mubr.msk.f32.mxu1 %vm5700_vm3, %v5699_v41  ;;  %5220 = vmatpush3.msra.mxu1 %v5763_v32 }
  0x33   :  { %5226 = vmatprep.subr.mxu0 %v5699_v41  ;;  %5221 = vmatprep.subr.mxu1 %v5699_v41 }
  0x34   :  { %5227 = vmatpush3.msra.mxu0 %v5755_v28  ;;  %5222 = vmatpush3.msra.mxu1 %v5768_v34 }
  0x35   :  { %5228 = vmatprep.subr.mxu0 %v5699_v41  ;;  %5224 = vmatmul.mubr.f32.vlgmr.msra.gmra.mxu1 %v5699_v41 }
  0x36   :  { %5235 = vmatprep.subr.mxu1 %v5699_v41  ;;  %5241 = vmatprep.mubr.msk.f32.mxu1 %vm5700_vm3, %v5699_v41 }
  0x37   :  { %5236 = vmatpush3.msra.mxu1 %v5802_v43  ;;  %5229 = vmatpush3.msra.mxu0 %v5763_v32 }
  0x38   :  { %5237 = vmatprep.subr.mxu1 %v5699_v41  ;;  %5230 = vmatprep.subr.mxu0 %v5699_v41 }
  0x39   :  { %5238 = vmatpush3.msra.mxu1 %v5812_v45  ;;  %5231 = vmatpush3.msra.mxu0 %v5768_v34 }
  0x3a   :  { %5239 = vmatprep.subr.mxu1 %v5699_v41  ;;  %5232 = vmatprep.mubr.msk.f32.mxu0 %vm5700_vm3, %v5699_v41 }
  0x3b   :  { %5240 = vmatpush3.msra.mxu1 %v5819_v46  ;;  %5244 = vmatprep.subr.mxu0 %v5699_v41 }
  0x3c   :  { %5253 = vmatprep.subr.mxu1 %v5699_v41 }
  0xcf   :  { %v5136_v48 = vpop.f32.mrf.mxu0 }
  0xd0   :  { %v122_v49 = vadd.f32 %v5136_v48, %v4888_v47 }
  0xd1   :  { %v111_v50 = vpop.f32.mrf.mxu0  ;;  %v5143_v52 = vpop.f32.mrf.mxu1 }
  0xd2   :  { %v112_v51 = vadd.f32 %v4888_v47, %v111_v50  ;;  %v209_v53 = vadd.f32 %v5143_v52, %v122_v49 }
  0xd3   :  { %v202_v55 = vpop.f32.mrf.mxu1 }
  0xd4   :  { %v5150_v54 = vpop.f32.mrf.mxu0  ;;  %v203_v57 = vadd.f32 %v202_v55, %v112_v51 }
  0xd5   :  { %v292_v56 = vadd.f32 %v5150_v54, %v209_v53 }
  0xd6   :  { %v284_v58 = vpop.f32.mrf.mxu0 }
  0xd7   :  { %v285_v59 = vadd.f32 %v284_v58, %v203_v57 }
  0xd8   :  { %v5157_v60 = vpop.f32.mrf.mxu1 }
  0xd9   :  { %v375_v61 = vadd.f32 %v5157_v60, %v292_v56 }
  0xda   :  { %v5164_v62 = vpop.f32.mrf.mxu0  ;;  %v366_v63 = vpop.f32.mrf.mxu1 }
  0xdb   :  { %v458_v0 = vadd.f32 %v5164_v62, %v375_v61  ;;  %v367_v1 = vadd.f32 %v366_v63, %v285_v59 }
  0xdc   :  { %v451_v2 = vpop.f32.mrf.mxu0 }
  0xdd   :  { %v452_v3 = vadd.f32 %v451_v2, %v367_v1 }
  0xde   :  { %v5171_v4 = vpop.f32.mrf.mxu1 }
  0xdf   :  { %v537_v5 = vadd.f32 %v5171_v4, %v458_v0 }
  0xe0   :  { %v530_v6 = vpop.f32.mrf.mxu1 }
  0xe1   :  { %v531_v7 = vadd.f32 %v530_v6, %v452_v3  ;;  %v542_v8 = vrot.slane %v537_v5, 7  ;;  %v1507_v9 = vrot.slane %v537_v5, 1  ;;  %v1987_v10 = vrot.slane %v537_v5, 2 }
  0xe2   :  { %v628_v11 = vpop.f32.mrf.mxu0  ;;  %v2467_v12 = vrot.slane %v537_v5, 3  ;;  %v2947_v13 = vrot.slane %v537_v5, 4  ;;  %v3427_v14 = vrot.slane %v537_v5, 5  ;;  %v3907_v15 = vrot.slane %v537_v5, 6 }
  0xe3   :  { %v544_v16 = vsel %vm543_vm4, %v542_v8, %v531_v7  ;;  %v1027_v17 = vrot.slane %v531_v7, 1  ;;  %v1506_v18 = vrot.slane %v531_v7, 2  ;;  %v1986_v19 = vrot.slane %v531_v7, 3 }
  0xe4   :  { %v629_v20 = vadd.f32 %v628_v11, %v544_v16  ;;  %v5180_v21 = vpop.f32.mrf.mxu0  ;;  %v2466_v22 = vrot.slane %v531_v7, 4  ;;  %v2946_v23 = vrot.slane %v531_v7, 5  ;;  %v3426_v24 = vrot.slane %v531_v7, 6 }
  0xe5   :  { %v5887_v25 = vsel %vm543_vm4, %v537_v5, %v1027_v17  ;;  %v5890_v26 = vsel %vm543_vm4, %v1507_v9, %v1506_v18  ;;  %v5893_v27 = vsel %vm543_vm4, %v1987_v10, %v1986_v19  ;;  %v3906_v29 = vrot.slane %v531_v7, 7 }
  0xe6   :  { %v714_v30 = vpop.f32.mrf.mxu1  ;;  %v5896_v31 = vsel %vm543_vm4, %v2467_v12, %v2466_v22  ;;  %v5899_v39 = vsel %vm543_vm4, %v2947_v13, %v2946_v23  ;;  %v5902_v42 = vsel %vm543_vm4, %v3427_v14, %v3426_v24 }
  0xe7   :  { %v5905_v44 = vsel %vm543_vm4, %v3907_v15, %v3906_v29  ;;  %v715_v48 = vadd.f32 %v714_v30, %v629_v20 }
  0xe8   :  { %v5189_v47 = vpop.f32.mrf.mxu1 }
  0xea   :  { %v792_v49 = vpop.f32.mrf.mxu0 }
  0xeb   :  { %v793_v51 = vadd.f32 %v792_v49, %v715_v48 }
  0xec   :  { %v5198_v50 = vpop.f32.mrf.mxu0 }
  0xee   :  { %v868_v52 = vpop.f32.mrf.mxu1 }
  0xef   :  { %v869_v54 = vadd.f32 %v868_v52, %v793_v51 }
  0xf0   :  { %v5207_v53 = vpop.f32.mrf.mxu1 }
  0xf1   :  { %v948_v55 = vpop.f32.mrf.mxu0 }
  0xf2   :  { %v949_v57 = vadd.f32 %v948_v55, %v869_v54 }
  0xf3   :  { %v5216_v56 = vpop.f32.mrf.mxu0 }
  0xf5   :  { %v1022_v58 = vpop.f32.mrf.mxu1 }
  0xf6   :  { %v1023_v59 = vadd.f32 %v1022_v58, %v949_v57 }
  0xf7   :  { %v5225_v60 = vpop.f32.mrf.mxu1 }
  0xf8   :  { %5661 = vtanh.f32 %v1023_v59 }
 0x105   :  { %v5662_v61 = vpop.eup %5661 }
 0x106   :  { %v1031_v62 = vsel %vm546_vm5, %v5662_v61, 0 }
 0x107   :  { %v1101_v63 = vand.u32 4294901760, %v1031_v62 }
 0x109   :  { %v1102_v0 = vsub.f32 %v1031_v62, %v1101_v63  ;;  %5242 = vmatmul.mubr.f32.vlgmr.msra.gmra.mxu1 %v1101_v63 }
 0x10a   :  { %5254 = vmatpush3.msra.mxu1 %v5755_v28  ;;  %5259 = vmatprep.mubr.msk.f32.mxu1 %vm5700_vm3, %v5699_v41 }
 0x10b   :  { %5255 = vmatprep.subr.mxu1 %v5699_v41  ;;  %v1103_v1 = vand.u32 4294901760, %v1102_v0 }
 0x10c   :  { %5256 = vmatpush3.msra.mxu1 %v5763_v32 }
 0x10d   :  { %5257 = vmatprep.subr.mxu1 %v5699_v41  ;;  %v1104_v2 = vsub.f32 %v1102_v0, %v1103_v1 }
 0x10e   :  { %5258 = vmatpush3.msra.mxu1 %v5768_v34 }
 0x10f   :  { %5260 = vmatmul.mubr.f32.vlgmr.msra.gmra.mxu1 %v1103_v1  ;;  %5271 = vmatprep.subr.mxu1 %v5699_v41  ;;  %v1105_v3 = vand.u32 4294901760, %v1104_v2 }
 0x110   :  { %5272 = vmatpush3.msra.mxu1 %v5755_v28  ;;  %5277 = vmatprep.mubr.msk.f32.mxu1 %vm5700_vm3, %v5699_v41 }
 0x111   :  { %5273 = vmatprep.subr.mxu1 %v5699_v41  ;;  %5233 = vmatmul.mubr.f32.vlgmr.msra.gmra.mxu0 %v1105_v3 }
 0x112   :  { %5245 = vmatpush3.msra.mxu0 %v5766_v33  ;;  %5274 = vmatpush3.msra.mxu1 %v5763_v32 }
 0x113   :  { %5246 = vmatprep.subr.mxu0 %v5699_v41  ;;  %5275 = vmatprep.subr.mxu1 %v5699_v41 }
 0x114   :  { %5247 = vmatpush3.msra.mxu0 %v5773_v35  ;;  %5276 = vmatpush3.msra.mxu1 %v5768_v34 }
 0x115   :  { %5248 = vmatprep.subr.mxu0 %v5699_v41  ;;  %5278 = vmatmul.mubr.f32.vlgmr.msra.gmra.mxu1 %v1101_v63 }
 0x116   :  { %5249 = vmatpush3.msra.mxu0 %v5780_v37  ;;  %5250 = vmatprep.mubr.msk.f32.mxu0 %vm5700_vm3, %v5699_v41 }
 0x117   :  { %5251 = vmatmul.mubr.f32.vlgmr.msra.gmra.mxu0 %v1102_v0  ;;  %5262 = vmatprep.subr.mxu0 %v5699_v41 }
 0x118   :  { %5263 = vmatpush3.msra.mxu0 %v5776_v36  ;;  %5268 = vmatprep.mubr.msk.f32.mxu0 %vm5700_vm3, %v5699_v41 }
 0x119   :  { %5264 = vmatprep.subr.mxu0 %v5699_v41  ;;  %5289 = vmatprep.subr.mxu1 %v5699_v41 }
 0x11a   :  { %5265 = vmatpush3.msra.mxu0 %v5785_v38  ;;  %5290 = vmatpush3.msra.mxu1 %v5802_v43 }
 0x11b   :  { %5266 = vmatprep.subr.mxu0 %v5699_v41  ;;  %5291 = vmatprep.subr.mxu1 %v5699_v41 }
 0x11c   :  { %5267 = vmatpush3.msra.mxu0 %v5792_v40  ;;  %5292 = vmatpush3.msra.mxu1 %v5812_v45 }
 0x11d   :  { %5269 = vmatmul.mubr.f32.vlgmr.msra.gmra.mxu0 %v1101_v63  ;;  %5293 = vmatprep.subr.mxu1 %v5699_v41 }
 0x11e   :  { %5294 = vmatpush3.msra.mxu1 %v5819_v46  ;;  %5295 = vmatprep.mubr.msk.f32.mxu1 %vm5700_vm3, %v5699_v41 }
 0x11f   :  { %5307 = vmatprep.subr.mxu1 %v5699_v41  ;;  %5280 = vmatprep.subr.mxu0 %v5699_v41 }
 0x120   :  { %5281 = vmatpush3.msra.mxu0 %v5755_v28  ;;  %5286 = vmatprep.mubr.msk.f32.mxu0 %vm5700_vm3, %v5699_v41 }
 0x121   :  { %5282 = vmatprep.subr.mxu0 %v5699_v41 }
 0x122   :  { %5283 = vmatpush3.msra.mxu0 %v5763_v32 }
 0x123   :  { %5284 = vmatprep.subr.mxu0 %v5699_v41 }
 0x124   :  { %5285 = vmatpush3.msra.mxu0 %v5768_v34 }
 0x125   :  { %5298 = vmatprep.subr.mxu0 %v5699_v41 }
 0x1c9   :  { %v1193_v4 = vpop.f32.mrf.mxu1 }
 0x1cb   :  { %v5243_v5 = vpop.f32.mrf.mxu1 }
 0x1cf   :  { %v1347_v6 = vpop.f32.mrf.mxu1 }
 0x1d1   :  { %v5261_v7 = vpop.f32.mrf.mxu1  ;;  %v1107_v8 = vpop.f32.mrf.mxu0 }
 0x1d2   :  { %v1108_v9 = vadd.f32 %v1107_v8, %v5887_v25 }
 0x1d3   :  { %v5234_v10 = vpop.f32.mrf.mxu0 }
 0x1d4   :  { %v1194_v11 = vadd.f32 %v1193_v4, %v1108_v9 }
 0x1d5   :  { %v1501_v12 = vpop.f32.mrf.mxu1 }
 0x1d7   :  { %v1271_v13 = vpop.f32.mrf.mxu0  ;;  %v5279_v14 = vpop.f32.mrf.mxu1 }
 0x1d8   :  { %v1272_v15 = vadd.f32 %v1271_v13, %v1194_v11 }
 0x1d9   :  { %v5252_v16 = vpop.f32.mrf.mxu0 }
 0x1da   :  { %v1348_v17 = vadd.f32 %v1347_v6, %v1272_v15 }
 0x1dd   :  { %v1427_v18 = vpop.f32.mrf.mxu0 }
 0x1de   :  { %v1428_v19 = vadd.f32 %v1427_v18, %v1348_v17 }
 0x1df   :  { %v5270_v20 = vpop.f32.mrf.mxu0 }
 0x1e0   :  { %v1502_v21 = vadd.f32 %v1501_v12, %v1428_v19 }
 0x1e2   :  { %5663 = vtanh.f32 %v1502_v21 }
 0x1ef   :  { %v5664_v22 = vpop.eup %5663 }
 0x1f0   :  { %v1511_v23 = vsel %vm546_vm5, %v5664_v22, 0 }
 0x1f1   :  { %v1581_v24 = vand.u32 4294901760, %v1511_v23 }
 0x1f3   :  { %v1582_v29 = vsub.f32 %v1511_v23, %v1581_v24  ;;  %5296 = vmatmul.mubr.f32.vlgmr.msra.gmra.mxu1 %v1581_v24 }
 0x1f4   :  { %5308 = vmatpush3.msra.mxu1 %v5755_v28  ;;  %5313 = vmatprep.mubr.msk.f32.mxu1 %vm5700_vm3, %v5699_v41 }
 0x1f5   :  { %5309 = vmatprep.subr.mxu1 %v5699_v41  ;;  %v1583_v25 = vand.u32 4294901760, %v1582_v29 }
 0x1f6   :  { %5310 = vmatpush3.msra.mxu1 %v5763_v32 }
 0x1f7   :  { %5311 = vmatprep.subr.mxu1 %v5699_v41  ;;  %v1584_v30 = vsub.f32 %v1582_v29, %v1583_v25 }
 0x1f8   :  { %5312 = vmatpush3.msra.mxu1 %v5768_v34 }
 0x1f9   :  { %5314 = vmatmul.mubr.f32.vlgmr.msra.gmra.mxu1 %v1583_v25  ;;  %5325 = vmatprep.subr.mxu1 %v5699_v41  ;;  %v1585_v47 = vand.u32 4294901760, %v1584_v30 }
 0x1fa   :  { %5326 = vmatpush3.msra.mxu1 %v5755_v28  ;;  %5331 = vmatprep.mubr.msk.f32.mxu1 %vm5700_vm3, %v5699_v41 }
 0x1fb   :  { %5327 = vmatprep.subr.mxu1 %v5699_v41  ;;  %5287 = vmatmul.mubr.f32.vlgmr.msra.gmra.mxu0 %v1585_v47 }
 0x1fc   :  { %5299 = vmatpush3.msra.mxu0 %v5766_v33  ;;  %5328 = vmatpush3.msra.mxu1 %v5763_v32 }
 0x1fd   :  { %5300 = vmatprep.subr.mxu0 %v5699_v41  ;;  %5329 = vmatprep.subr.mxu1 %v5699_v41 }
 0x1fe   :  { %5301 = vmatpush3.msra.mxu0 %v5773_v35  ;;  %5330 = vmatpush3.msra.mxu1 %v5768_v34 }
 0x1ff   :  { %5302 = vmatprep.subr.mxu0 %v5699_v41  ;;  %5332 = vmatmul.mubr.f32.vlgmr.msra.gmra.mxu1 %v1581_v24 }
 0x200   :  { %5303 = vmatpush3.msra.mxu0 %v5780_v37  ;;  %5304 = vmatprep.mubr.msk.f32.mxu0 %vm5700_vm3, %v5699_v41 }
 0x201   :  { %5305 = vmatmul.mubr.f32.vlgmr.msra.gmra.mxu0 %v1582_v29  ;;  %5316 = vmatprep.subr.mxu0 %v5699_v41 }
 0x202   :  { %5317 = vmatpush3.msra.mxu0 %v5776_v36  ;;  %5322 = vmatprep.mubr.msk.f32.mxu0 %vm5700_vm3, %v5699_v41 }
 0x203   :  { %5318 = vmatprep.subr.mxu0 %v5699_v41  ;;  %5343 = vmatprep.subr.mxu1 %v5699_v41 }
 0x204   :  { %5319 = vmatpush3.msra.mxu0 %v5785_v38  ;;  %5344 = vmatpush3.msra.mxu1 %v5802_v43 }
 0x205   :  { %5320 = vmatprep.subr.mxu0 %v5699_v41  ;;  %5345 = vmatprep.subr.mxu1 %v5699_v41 }
 0x206   :  { %5321 = vmatpush3.msra.mxu0 %v5792_v40  ;;  %5346 = vmatpush3.msra.mxu1 %v5812_v45 }
 0x207   :  { %5323 = vmatmul.mubr.f32.vlgmr.msra.gmra.mxu0 %v1581_v24  ;;  %5347 = vmatprep.subr.mxu1 %v5699_v41 }
 0x208   :  { %5348 = vmatpush3.msra.mxu1 %v5819_v46  ;;  %5349 = vmatprep.mubr.msk.f32.mxu1 %vm5700_vm3, %v5699_v41 }
 0x209   :  { %5361 = vmatprep.subr.mxu1 %v5699_v41  ;;  %5334 = vmatprep.subr.mxu0 %v5699_v41 }
 0x20a   :  { %5335 = vmatpush3.msra.mxu0 %v5755_v28  ;;  %5340 = vmatprep.mubr.msk.f32.mxu0 %vm5700_vm3, %v5699_v41 }
 0x20b   :  { %5336 = vmatprep.subr.mxu0 %v5699_v41 }
 0x20c   :  { %5337 = vmatpush3.msra.mxu0 %v5763_v32 }
 0x20d   :  { %5338 = vmatprep.subr.mxu0 %v5699_v41 }
 0x20e   :  { %5339 = vmatpush3.msra.mxu0 %v5768_v34 }
 0x20f   :  { %5352 = vmatprep.subr.mxu0 %v5699_v41 }
 0x2b3   :  { %v1673_v48 = vpop.f32.mrf.mxu1 }
 0x2b5   :  { %v5297_v49 = vpop.f32.mrf.mxu1 }
 0x2b9   :  { %v1827_v50 = vpop.f32.mrf.mxu1 }
 0x2bb   :  { %v5315_v51 = vpop.f32.mrf.mxu1  ;;  %v1587_v52 = vpop.f32.mrf.mxu0 }
 0x2bc   :  { %v1588_v53 = vadd.f32 %v1587_v52, %v5890_v26 }
 0x2bd   :  { %v5288_v54 = vpop.f32.mrf.mxu0 }
 0x2be   :  { %v1674_v55 = vadd.f32 %v1673_v48, %v1588_v53 }
 0x2bf   :  { %v1981_v56 = vpop.f32.mrf.mxu1 }
 0x2c1   :  { %v1751_v57 = vpop.f32.mrf.mxu0  ;;  %v5333_v58 = vpop.f32.mrf.mxu1 }
 0x2c2   :  { %v1752_v59 = vadd.f32 %v1751_v57, %v1674_v55 }
 0x2c3   :  { %v5306_v60 = vpop.f32.mrf.mxu0 }
 0x2c4   :  { %v1828_v61 = vadd.f32 %v1827_v50, %v1752_v59 }
 0x2c7   :  { %v1907_v62 = vpop.f32.mrf.mxu0 }
 0x2c8   :  { %v1908_v63 = vadd.f32 %v1907_v62, %v1828_v61 }
 0x2c9   :  { %v5324_v0 = vpop.f32.mrf.mxu0 }
 0x2ca   :  { %v1982_v1 = vadd.f32 %v1981_v56, %v1908_v63 }
 0x2cc   :  { %5665 = vtanh.f32 %v1982_v1 }
 0x2d9   :  { %v5666_v2 = vpop.eup %5665 }
 0x2da   :  { %v1991_v3 = vsel %vm546_vm5, %v5666_v2, 0 }
 0x2db   :  { %v2061_v4 = vand.u32 4294901760, %v1991_v3 }
 0x2dd   :  { %v2062_v5 = vsub.f32 %v1991_v3, %v2061_v4  ;;  %5350 = vmatmul.mubr.f32.vlgmr.msra.gmra.mxu1 %v2061_v4 }
 0x2de   :  { %5362 = vmatpush3.msra.mxu1 %v5755_v28  ;;  %5367 = vmatprep.mubr.msk.f32.mxu1 %vm5700_vm3, %v5699_v41 }
 0x2df   :  { %5363 = vmatprep.subr.mxu1 %v5699_v41  ;;  %v2063_v26 = vand.u32 4294901760, %v2062_v5 }
 0x2e0   :  { %5364 = vmatpush3.msra.mxu1 %v5763_v32 }
 0x2e1   :  { %5365 = vmatprep.subr.mxu1 %v5699_v41  ;;  %v2064_v6 = vsub.f32 %v2062_v5, %v2063_v26 }
 0x2e2   :  { %5366 = vmatpush3.msra.mxu1 %v5768_v34 }
 0x2e3   :  { %5368 = vmatmul.mubr.f32.vlgmr.msra.gmra.mxu1 %v2063_v26  ;;  %5379 = vmatprep.subr.mxu1 %v5699_v41  ;;  %v2065_v7 = vand.u32 4294901760, %v2064_v6 }
 0x2e4   :  { %5380 = vmatpush3.msra.mxu1 %v5755_v28  ;;  %5385 = vmatprep.mubr.msk.f32.mxu1 %vm5700_vm3, %v5699_v41 }
 0x2e5   :  { %5381 = vmatprep.subr.mxu1 %v5699_v41  ;;  %5341 = vmatmul.mubr.f32.vlgmr.msra.gmra.mxu0 %v2065_v7 }
 0x2e6   :  { %5353 = vmatpush3.msra.mxu0 %v5766_v33  ;;  %5382 = vmatpush3.msra.mxu1 %v5763_v32 }
 0x2e7   :  { %5354 = vmatprep.subr.mxu0 %v5699_v41  ;;  %5383 = vmatprep.subr.mxu1 %v5699_v41 }
 0x2e8   :  { %5355 = vmatpush3.msra.mxu0 %v5773_v35  ;;  %5384 = vmatpush3.msra.mxu1 %v5768_v34 }
 0x2e9   :  { %5356 = vmatprep.subr.mxu0 %v5699_v41  ;;  %5386 = vmatmul.mubr.f32.vlgmr.msra.gmra.mxu1 %v2061_v4 }
 0x2ea   :  { %5357 = vmatpush3.msra.mxu0 %v5780_v37  ;;  %5358 = vmatprep.mubr.msk.f32.mxu0 %vm5700_vm3, %v5699_v41 }
 0x2eb   :  { %5359 = vmatmul.mubr.f32.vlgmr.msra.gmra.mxu0 %v2062_v5  ;;  %5370 = vmatprep.subr.mxu0 %v5699_v41 }
 0x2ec   :  { %5371 = vmatpush3.msra.mxu0 %v5776_v36  ;;  %5376 = vmatprep.mubr.msk.f32.mxu0 %vm5700_vm3, %v5699_v41 }
 0x2ed   :  { %5372 = vmatprep.subr.mxu0 %v5699_v41  ;;  %5397 = vmatprep.subr.mxu1 %v5699_v41 }
 0x2ee   :  { %5373 = vmatpush3.msra.mxu0 %v5785_v38  ;;  %5398 = vmatpush3.msra.mxu1 %v5802_v43 }
 0x2ef   :  { %5374 = vmatprep.subr.mxu0 %v5699_v41  ;;  %5399 = vmatprep.subr.mxu1 %v5699_v41 }
 0x2f0   :  { %5375 = vmatpush3.msra.mxu0 %v5792_v40  ;;  %5400 = vmatpush3.msra.mxu1 %v5812_v45 }
 0x2f1   :  { %5377 = vmatmul.mubr.f32.vlgmr.msra.gmra.mxu0 %v2061_v4  ;;  %5401 = vmatprep.subr.mxu1 %v5699_v41 }
 0x2f2   :  { %5402 = vmatpush3.msra.mxu1 %v5819_v46  ;;  %5403 = vmatprep.mubr.msk.f32.mxu1 %vm5700_vm3, %v5699_v41 }
 0x2f3   :  { %5415 = vmatprep.subr.mxu1 %v5699_v41  ;;  %5388 = vmatprep.subr.mxu0 %v5699_v41 }
 0x2f4   :  { %5389 = vmatpush3.msra.mxu0 %v5755_v28  ;;  %5394 = vmatprep.mubr.msk.f32.mxu0 %vm5700_vm3, %v5699_v41 }
 0x2f5   :  { %5390 = vmatprep.subr.mxu0 %v5699_v41 }
 0x2f6   :  { %5391 = vmatpush3.msra.mxu0 %v5763_v32 }
 0x2f7   :  { %5392 = vmatprep.subr.mxu0 %v5699_v41 }
 0x2f8   :  { %5393 = vmatpush3.msra.mxu0 %v5768_v34 }
 0x2f9   :  { %5406 = vmatprep.subr.mxu0 %v5699_v41 }
 0x39d   :  { %v2153_v8 = vpop.f32.mrf.mxu1 }
 0x39f   :  { %v5351_v9 = vpop.f32.mrf.mxu1 }
 0x3a3   :  { %v2307_v10 = vpop.f32.mrf.mxu1 }
 0x3a5   :  { %v5369_v11 = vpop.f32.mrf.mxu1  ;;  %v2067_v12 = vpop.f32.mrf.mxu0 }
 0x3a6   :  { %v2068_v13 = vadd.f32 %v2067_v12, %v5893_v27 }
 0x3a7   :  { %v5342_v14 = vpop.f32.mrf.mxu0 }
 0x3a8   :  { %v2154_v15 = vadd.f32 %v2153_v8, %v2068_v13 }
 0x3a9   :  { %v2461_v16 = vpop.f32.mrf.mxu1 }
 0x3ab   :  { %v2231_v17 = vpop.f32.mrf.mxu0  ;;  %v5387_v18 = vpop.f32.mrf.mxu1 }
 0x3ac   :  { %v2232_v19 = vadd.f32 %v2231_v17, %v2154_v15 }
 0x3ad   :  { %v5360_v20 = vpop.f32.mrf.mxu0 }
 0x3ae   :  { %v2308_v21 = vadd.f32 %v2307_v10, %v2232_v19 }
 0x3b1   :  { %v2387_v22 = vpop.f32.mrf.mxu0 }
 0x3b2   :  { %v2388_v23 = vadd.f32 %v2387_v22, %v2308_v21 }
 0x3b3   :  { %v5378_v24 = vpop.f32.mrf.mxu0 }
 0x3b4   :  { %v2462_v29 = vadd.f32 %v2461_v16, %v2388_v23 }
 0x3b6   :  { %5667 = vtanh.f32 %v2462_v29 }
 0x3c3   :  { %v5668_v25 = vpop.eup %5667 }
 0x3c4   :  { %v2471_v30 = vsel %vm546_vm5, %v5668_v25, 0 }
 0x3c5   :  { %v2541_v47 = vand.u32 4294901760, %v2471_v30 }
 0x3c7   :  { %v2542_v48 = vsub.f32 %v2471_v30, %v2541_v47  ;;  %5404 = vmatmul.mubr.f32.vlgmr.msra.gmra.mxu1 %v2541_v47 }
 0x3c8   :  { %5416 = vmatpush3.msra.mxu1 %v5755_v28  ;;  %5421 = vmatprep.mubr.msk.f32.mxu1 %vm5700_vm3, %v5699_v41 }
 0x3c9   :  { %5417 = vmatprep.subr.mxu1 %v5699_v41  ;;  %v2543_v27 = vand.u32 4294901760, %v2542_v48 }
 0x3ca   :  { %5418 = vmatpush3.msra.mxu1 %v5763_v32 }
 0x3cb   :  { %5419 = vmatprep.subr.mxu1 %v5699_v41  ;;  %v2544_v49 = vsub.f32 %v2542_v48, %v2543_v27 }
 0x3cc   :  { %5420 = vmatpush3.msra.mxu1 %v5768_v34 }
 0x3cd   :  { %5422 = vmatmul.mubr.f32.vlgmr.msra.gmra.mxu1 %v2543_v27  ;;  %5433 = vmatprep.subr.mxu1 %v5699_v41  ;;  %v2545_v50 = vand.u32 4294901760, %v2544_v49 }
 0x3ce   :  { %5434 = vmatpush3.msra.mxu1 %v5755_v28  ;;  %5439 = vmatprep.mubr.msk.f32.mxu1 %vm5700_vm3, %v5699_v41 }
 0x3cf   :  { %5435 = vmatprep.subr.mxu1 %v5699_v41  ;;  %5395 = vmatmul.mubr.f32.vlgmr.msra.gmra.mxu0 %v2545_v50 }
 0x3d0   :  { %5407 = vmatpush3.msra.mxu0 %v5766_v33  ;;  %5436 = vmatpush3.msra.mxu1 %v5763_v32 }
 0x3d1   :  { %5408 = vmatprep.subr.mxu0 %v5699_v41  ;;  %5437 = vmatprep.subr.mxu1 %v5699_v41 }
 0x3d2   :  { %5409 = vmatpush3.msra.mxu0 %v5773_v35  ;;  %5438 = vmatpush3.msra.mxu1 %v5768_v34 }
 0x3d3   :  { %5410 = vmatprep.subr.mxu0 %v5699_v41  ;;  %5440 = vmatmul.mubr.f32.vlgmr.msra.gmra.mxu1 %v2541_v47 }
 0x3d4   :  { %5411 = vmatpush3.msra.mxu0 %v5780_v37  ;;  %5412 = vmatprep.mubr.msk.f32.mxu0 %vm5700_vm3, %v5699_v41 }
 0x3d5   :  { %5413 = vmatmul.mubr.f32.vlgmr.msra.gmra.mxu0 %v2542_v48  ;;  %5424 = vmatprep.subr.mxu0 %v5699_v41 }
 0x3d6   :  { %5425 = vmatpush3.msra.mxu0 %v5776_v36  ;;  %5430 = vmatprep.mubr.msk.f32.mxu0 %vm5700_vm3, %v5699_v41 }
 0x3d7   :  { %5426 = vmatprep.subr.mxu0 %v5699_v41  ;;  %5451 = vmatprep.subr.mxu1 %v5699_v41 }
 0x3d8   :  { %5427 = vmatpush3.msra.mxu0 %v5785_v38  ;;  %5452 = vmatpush3.msra.mxu1 %v5802_v43 }
 0x3d9   :  { %5428 = vmatprep.subr.mxu0 %v5699_v41  ;;  %5453 = vmatprep.subr.mxu1 %v5699_v41 }
 0x3da   :  { %5429 = vmatpush3.msra.mxu0 %v5792_v40  ;;  %5454 = vmatpush3.msra.mxu1 %v5812_v45 }
 0x3db   :  { %5431 = vmatmul.mubr.f32.vlgmr.msra.gmra.mxu0 %v2541_v47  ;;  %5455 = vmatprep.subr.mxu1 %v5699_v41 }
 0x3dc   :  { %5456 = vmatpush3.msra.mxu1 %v5819_v46  ;;  %5457 = vmatprep.mubr.msk.f32.mxu1 %vm5700_vm3, %v5699_v41 }
 0x3dd   :  { %5469 = vmatprep.subr.mxu1 %v5699_v41  ;;  %5442 = vmatprep.subr.mxu0 %v5699_v41 }
 0x3de   :  { %5443 = vmatpush3.msra.mxu0 %v5755_v28  ;;  %5448 = vmatprep.mubr.msk.f32.mxu0 %vm5700_vm3, %v5699_v41 }
 0x3df   :  { %5444 = vmatprep.subr.mxu0 %v5699_v41 }
 0x3e0   :  { %5445 = vmatpush3.msra.mxu0 %v5763_v32 }
 0x3e1   :  { %5446 = vmatprep.subr.mxu0 %v5699_v41 }
 0x3e2   :  { %5447 = vmatpush3.msra.mxu0 %v5768_v34 }
 0x3e3   :  { %5460 = vmatprep.subr.mxu0 %v5699_v41 }
 0x487   :  { %v2633_v51 = vpop.f32.mrf.mxu1 }
 0x489   :  { %v5405_v52 = vpop.f32.mrf.mxu1 }
 0x48d   :  { %v2787_v53 = vpop.f32.mrf.mxu1 }
 0x48f   :  { %v5423_v54 = vpop.f32.mrf.mxu1  ;;  %v2547_v55 = vpop.f32.mrf.mxu0 }
 0x490   :  { %v2548_v56 = vadd.f32 %v2547_v55, %v5896_v31 }
 0x491   :  { %v5396_v57 = vpop.f32.mrf.mxu0 }
 0x492   :  { %v2634_v58 = vadd.f32 %v2633_v51, %v2548_v56 }
 0x493   :  { %v2941_v59 = vpop.f32.mrf.mxu1 }
 0x495   :  { %v2711_v60 = vpop.f32.mrf.mxu0  ;;  %v5441_v61 = vpop.f32.mrf.mxu1 }
 0x496   :  { %v2712_v62 = vadd.f32 %v2711_v60, %v2634_v58 }
 0x497   :  { %v5414_v63 = vpop.f32.mrf.mxu0 }
 0x498   :  { %v2788_v0 = vadd.f32 %v2787_v53, %v2712_v62 }
 0x49b   :  { %v2867_v1 = vpop.f32.mrf.mxu0 }
 0x49c   :  { %v2868_v2 = vadd.f32 %v2867_v1, %v2788_v0 }
 0x49d   :  { %v5432_v3 = vpop.f32.mrf.mxu0 }
 0x49e   :  { %v2942_v4 = vadd.f32 %v2941_v59, %v2868_v2 }
 0x4a0   :  { %5669 = vtanh.f32 %v2942_v4 }
 0x4ad   :  { %v5670_v5 = vpop.eup %5669 }
 0x4ae   :  { %v2951_v26 = vsel %vm546_vm5, %v5670_v5, 0 }
 0x4af   :  { %v3021_v6 = vand.u32 4294901760, %v2951_v26 }
 0x4b1   :  { %v3022_v7 = vsub.f32 %v2951_v26, %v3021_v6  ;;  %5458 = vmatmul.mubr.f32.vlgmr.msra.gmra.mxu1 %v3021_v6 }
 0x4b2   :  { %5470 = vmatpush3.msra.mxu1 %v5755_v28  ;;  %5475 = vmatprep.mubr.msk.f32.mxu1 %vm5700_vm3, %v5699_v41 }
 0x4b3   :  { %5471 = vmatprep.subr.mxu1 %v5699_v41  ;;  %v3023_v31 = vand.u32 4294901760, %v3022_v7 }
 0x4b4   :  { %5472 = vmatpush3.msra.mxu1 %v5763_v32 }
 0x4b5   :  { %5473 = vmatprep.subr.mxu1 %v5699_v41  ;;  %v3024_v8 = vsub.f32 %v3022_v7, %v3023_v31 }
 0x4b6   :  { %5474 = vmatpush3.msra.mxu1 %v5768_v34 }
 0x4b7   :  { %5476 = vmatmul.mubr.f32.vlgmr.msra.gmra.mxu1 %v3023_v31  ;;  %5487 = vmatprep.subr.mxu1 %v5699_v41  ;;  %v3025_v9 = vand.u32 4294901760, %v3024_v8 }
 0x4b8   :  { %5488 = vmatpush3.msra.mxu1 %v5755_v28  ;;  %5493 = vmatprep.mubr.msk.f32.mxu1 %vm5700_vm3, %v5699_v41 }
 0x4b9   :  { %5489 = vmatprep.subr.mxu1 %v5699_v41  ;;  %5449 = vmatmul.mubr.f32.vlgmr.msra.gmra.mxu0 %v3025_v9 }
 0x4ba   :  { %5461 = vmatpush3.msra.mxu0 %v5766_v33  ;;  %5490 = vmatpush3.msra.mxu1 %v5763_v32 }
 0x4bb   :  { %5462 = vmatprep.subr.mxu0 %v5699_v41  ;;  %5491 = vmatprep.subr.mxu1 %v5699_v41 }
 0x4bc   :  { %5463 = vmatpush3.msra.mxu0 %v5773_v35  ;;  %5492 = vmatpush3.msra.mxu1 %v5768_v34 }
 0x4bd   :  { %5464 = vmatprep.subr.mxu0 %v5699_v41  ;;  %5494 = vmatmul.mubr.f32.vlgmr.msra.gmra.mxu1 %v3021_v6 }
 0x4be   :  { %5465 = vmatpush3.msra.mxu0 %v5780_v37  ;;  %5466 = vmatprep.mubr.msk.f32.mxu0 %vm5700_vm3, %v5699_v41 }
 0x4bf   :  { %5467 = vmatmul.mubr.f32.vlgmr.msra.gmra.mxu0 %v3022_v7  ;;  %5478 = vmatprep.subr.mxu0 %v5699_v41 }
 0x4c0   :  { %5479 = vmatpush3.msra.mxu0 %v5776_v36  ;;  %5484 = vmatprep.mubr.msk.f32.mxu0 %vm5700_vm3, %v5699_v41 }
 0x4c1   :  { %5480 = vmatprep.subr.mxu0 %v5699_v41  ;;  %5505 = vmatprep.subr.mxu1 %v5699_v41 }
 0x4c2   :  { %5481 = vmatpush3.msra.mxu0 %v5785_v38  ;;  %5506 = vmatpush3.msra.mxu1 %v5802_v43 }
 0x4c3   :  { %5482 = vmatprep.subr.mxu0 %v5699_v41  ;;  %5507 = vmatprep.subr.mxu1 %v5699_v41 }
 0x4c4   :  { %5483 = vmatpush3.msra.mxu0 %v5792_v40  ;;  %5508 = vmatpush3.msra.mxu1 %v5812_v45 }
 0x4c5   :  { %5485 = vmatmul.mubr.f32.vlgmr.msra.gmra.mxu0 %v3021_v6  ;;  %5509 = vmatprep.subr.mxu1 %v5699_v41 }
 0x4c6   :  { %5510 = vmatpush3.msra.mxu1 %v5819_v46  ;;  %5511 = vmatprep.mubr.msk.f32.mxu1 %vm5700_vm3, %v5699_v41 }
 0x4c7   :  { %5523 = vmatprep.subr.mxu1 %v5699_v41  ;;  %5496 = vmatprep.subr.mxu0 %v5699_v41 }
 0x4c8   :  { %5497 = vmatpush3.msra.mxu0 %v5755_v28  ;;  %5502 = vmatprep.mubr.msk.f32.mxu0 %vm5700_vm3, %v5699_v41 }
 0x4c9   :  { %5498 = vmatprep.subr.mxu0 %v5699_v41 }
 0x4ca   :  { %5499 = vmatpush3.msra.mxu0 %v5763_v32 }
 0x4cb   :  { %5500 = vmatprep.subr.mxu0 %v5699_v41 }
 0x4cc   :  { %5501 = vmatpush3.msra.mxu0 %v5768_v34 }
 0x4cd   :  { %5514 = vmatprep.subr.mxu0 %v5699_v41 }
 0x571   :  { %v3113_v10 = vpop.f32.mrf.mxu1 }
 0x573   :  { %v5459_v11 = vpop.f32.mrf.mxu1 }
 0x577   :  { %v3267_v12 = vpop.f32.mrf.mxu1 }
 0x579   :  { %v5477_v13 = vpop.f32.mrf.mxu1  ;;  %v3027_v14 = vpop.f32.mrf.mxu0 }
 0x57a   :  { %v3028_v15 = vadd.f32 %v3027_v14, %v5899_v39 }
 0x57b   :  { %v5450_v16 = vpop.f32.mrf.mxu0 }
 0x57c   :  { %v3114_v17 = vadd.f32 %v3113_v10, %v3028_v15 }
 0x57d   :  { %v3421_v18 = vpop.f32.mrf.mxu1 }
 0x57f   :  { %v3191_v19 = vpop.f32.mrf.mxu0  ;;  %v5495_v20 = vpop.f32.mrf.mxu1 }
 0x580   :  { %v3192_v21 = vadd.f32 %v3191_v19, %v3114_v17 }
 0x581   :  { %v5468_v22 = vpop.f32.mrf.mxu0 }
 0x582   :  { %v3268_v23 = vadd.f32 %v3267_v12, %v3192_v21 }
 0x585   :  { %v3347_v24 = vpop.f32.mrf.mxu0 }
 0x586   :  { %v3348_v29 = vadd.f32 %v3347_v24, %v3268_v23 }
 0x587   :  { %v5486_v25 = vpop.f32.mrf.mxu0 }
 0x588   :  { %v3422_v30 = vadd.f32 %v3421_v18, %v3348_v29 }
 0x58a   :  { %5671 = vtanh.f32 %v3422_v30 }
 0x597   :  { %v5672_v47 = vpop.eup %5671 }
 0x598   :  { %v3431_v48 = vsel %vm546_vm5, %v5672_v47, 0 }
 0x599   :  { %v3501_v27 = vand.u32 4294901760, %v3431_v48 }
 0x59b   :  { %v3502_v49 = vsub.f32 %v3431_v48, %v3501_v27  ;;  %5512 = vmatmul.mubr.f32.vlgmr.msra.gmra.mxu1 %v3501_v27 }
 0x59c   :  { %5524 = vmatpush3.msra.mxu1 %v5755_v28  ;;  %5529 = vmatprep.mubr.msk.f32.mxu1 %vm5700_vm3, %v5699_v41 }
 0x59d   :  { %5525 = vmatprep.subr.mxu1 %v5699_v41  ;;  %v3503_v39 = vand.u32 4294901760, %v3502_v49 }
 0x59e   :  { %5526 = vmatpush3.msra.mxu1 %v5763_v32 }
 0x59f   :  { %5527 = vmatprep.subr.mxu1 %v5699_v41  ;;  %v3504_v50 = vsub.f32 %v3502_v49, %v3503_v39 }
 0x5a0   :  { %5528 = vmatpush3.msra.mxu1 %v5768_v34 }
 0x5a1   :  { %5530 = vmatmul.mubr.f32.vlgmr.msra.gmra.mxu1 %v3503_v39  ;;  %5541 = vmatprep.subr.mxu1 %v5699_v41  ;;  %v3505_v51 = vand.u32 4294901760, %v3504_v50 }
 0x5a2   :  { %5542 = vmatpush3.msra.mxu1 %v5755_v28  ;;  %5547 = vmatprep.mubr.msk.f32.mxu1 %vm5700_vm3, %v5699_v41 }
 0x5a3   :  { %5543 = vmatprep.subr.mxu1 %v5699_v41  ;;  %5503 = vmatmul.mubr.f32.vlgmr.msra.gmra.mxu0 %v3505_v51 }
 0x5a4   :  { %5515 = vmatpush3.msra.mxu0 %v5766_v33  ;;  %5544 = vmatpush3.msra.mxu1 %v5763_v32 }
 0x5a5   :  { %5516 = vmatprep.subr.mxu0 %v5699_v41  ;;  %5545 = vmatprep.subr.mxu1 %v5699_v41 }
 0x5a6   :  { %5517 = vmatpush3.msra.mxu0 %v5773_v35  ;;  %5546 = vmatpush3.msra.mxu1 %v5768_v34 }
 0x5a7   :  { %5518 = vmatprep.subr.mxu0 %v5699_v41  ;;  %5548 = vmatmul.mubr.f32.vlgmr.msra.gmra.mxu1 %v3501_v27 }
 0x5a8   :  { %5519 = vmatpush3.msra.mxu0 %v5780_v37  ;;  %5520 = vmatprep.mubr.msk.f32.mxu0 %vm5700_vm3, %v5699_v41 }
 0x5a9   :  { %5521 = vmatmul.mubr.f32.vlgmr.msra.gmra.mxu0 %v3502_v49  ;;  %5532 = vmatprep.subr.mxu0 %v5699_v41 }
 0x5aa   :  { %5533 = vmatpush3.msra.mxu0 %v5776_v36  ;;  %5538 = vmatprep.mubr.msk.f32.mxu0 %vm5700_vm3, %v5699_v41 }
 0x5ab   :  { %5534 = vmatprep.subr.mxu0 %v5699_v41  ;;  %5559 = vmatprep.subr.mxu1 %v5699_v41 }
 0x5ac   :  { %5535 = vmatpush3.msra.mxu0 %v5785_v38  ;;  %5560 = vmatpush3.msra.mxu1 %v5802_v43 }
 0x5ad   :  { %5536 = vmatprep.subr.mxu0 %v5699_v41  ;;  %5561 = vmatprep.subr.mxu1 %v5699_v41 }
 0x5ae   :  { %5537 = vmatpush3.msra.mxu0 %v5792_v40  ;;  %5562 = vmatpush3.msra.mxu1 %v5812_v45 }
 0x5af   :  { %5539 = vmatmul.mubr.f32.vlgmr.msra.gmra.mxu0 %v3501_v27  ;;  %5563 = vmatprep.subr.mxu1 %v5699_v41 }
 0x5b0   :  { %5564 = vmatpush3.msra.mxu1 %v5819_v46  ;;  %5565 = vmatprep.mubr.msk.f32.mxu1 %vm5700_vm3, %v5699_v41 }
 0x5b1   :  { %5577 = vmatprep.subr.mxu1 %v5699_v41  ;;  %5550 = vmatprep.subr.mxu0 %v5699_v41 }
 0x5b2   :  { %5551 = vmatpush3.msra.mxu0 %v5755_v28  ;;  %5556 = vmatprep.mubr.msk.f32.mxu0 %vm5700_vm3, %v5699_v41 }
 0x5b3   :  { %5552 = vmatprep.subr.mxu0 %v5699_v41 }
 0x5b4   :  { %5553 = vmatpush3.msra.mxu0 %v5763_v32 }
 0x5b5   :  { %5554 = vmatprep.subr.mxu0 %v5699_v41 }
 0x5b6   :  { %5555 = vmatpush3.msra.mxu0 %v5768_v34 }
 0x5b7   :  { %5568 = vmatprep.subr.mxu0 %v5699_v41 }
 0x65b   :  { %v3593_v43 = vpop.f32.mrf.mxu1 }
 0x65d   :  { %v5513_v45 = vpop.f32.mrf.mxu1 }
 0x661   :  { %v3747_v46 = vpop.f32.mrf.mxu1 }
 0x663   :  { %v5531_v52 = vpop.f32.mrf.mxu1  ;;  %v3507_v53 = vpop.f32.mrf.mxu0 }
 0x664   :  { %v3508_v54 = vadd.f32 %v3507_v53, %v5902_v42 }
 0x665   :  { %v5504_v55 = vpop.f32.mrf.mxu0 }
 0x666   :  { %v3594_v56 = vadd.f32 %v3593_v43, %v3508_v54 }
 0x667   :  { %v3901_v57 = vpop.f32.mrf.mxu1 }
 0x669   :  { %v3671_v58 = vpop.f32.mrf.mxu0  ;;  %v5549_v59 = vpop.f32.mrf.mxu1 }
 0x66a   :  { %v3672_v60 = vadd.f32 %v3671_v58, %v3594_v56  ;;  %v4889_v58 = vld [vmem:[%s6327_s2 + $0x18] ss:$0 sm:$0xff] }
 0x66b   :  { %v5522_v61 = vpop.f32.mrf.mxu0 }
 0x66c   :  { %v3748_v62 = vadd.f32 %v3747_v46, %v3672_v60 }
 0x66f   :  { %v3827_v63 = vpop.f32.mrf.mxu0 }
 0x670   :  { %v3828_v0 = vadd.f32 %v3827_v63, %v3748_v62 }
 0x671   :  { %v5540_v1 = vpop.f32.mrf.mxu0 }
 0x672   :  { %v3902_v2 = vadd.f32 %v3901_v57, %v3828_v0 }
 0x674   :  { %5673 = vtanh.f32 %v3902_v2 }
 0x681   :  { %v5674_v3 = vpop.eup %5673 }
 0x682   :  { %v3911_v4 = vsel %vm546_vm5, %v5674_v3, 0 }
 0x683   :  { %v3981_v5 = vand.u32 4294901760, %v3911_v4 }
 0x685   :  { %v3982_v26 = vsub.f32 %v3911_v4, %v3981_v5  ;;  %5566 = vmatmul.mubr.f32.vlgmr.msra.gmra.mxu1 %v3981_v5 }
 0x686   :  { %5578 = vmatpush3.msra.mxu1 %v5755_v28  ;;  %5583 = vmatprep.mubr.msk.f32.mxu1 %vm5700_vm3, %v5699_v41 }
 0x687   :  { %5579 = vmatprep.subr.mxu1 %v5699_v41  ;;  %v3983_v42 = vand.u32 4294901760, %v3982_v26 }
 0x688   :  { %5580 = vmatpush3.msra.mxu1 %v5763_v32 }
 0x689   :  { %5581 = vmatprep.subr.mxu1 %v5699_v41  ;;  %v3984_v6 = vsub.f32 %v3982_v26, %v3983_v42 }
 0x68a   :  { %5582 = vmatpush3.msra.mxu1 %v5768_v34 }
 0x68b   :  { %5584 = vmatmul.mubr.f32.vlgmr.msra.gmra.mxu1 %v3983_v42  ;;  %5595 = vmatprep.subr.mxu1 %v5699_v41  ;;  %v3985_v7 = vand.u32 4294901760, %v3984_v6 }
 0x68c   :  { %5596 = vmatpush3.msra.mxu1 %v5755_v28  ;;  %5601 = vmatprep.mubr.msk.f32.mxu1 %vm5700_vm3, %v5699_v41  ;;  %v4388_v28 = vld [vmem:[%s6327_s2 + $0x10] sm:$0xf] }
 0x68d   :  { %5597 = vmatprep.subr.mxu1 %v5699_v41  ;;  %5557 = vmatmul.mubr.f32.vlgmr.msra.gmra.mxu0 %v3985_v7 }
 0x68e   :  { %5569 = vmatpush3.msra.mxu0 %v5766_v33  ;;  %5598 = vmatpush3.msra.mxu1 %v5763_v32  ;;  %v4398_v32 = vsel %vm550_vm2, %v4388_v28, 0  ;;  %v4387_v33 = vld [vmem:[%s6327_s2 + $0x8] sm:$0xff] }
 0x68f   :  { %5570 = vmatprep.subr.mxu0 %v5699_v41  ;;  %5599 = vmatprep.subr.mxu1 %v5699_v41 }
 0x690   :  { %5571 = vmatpush3.msra.mxu0 %v5773_v35  ;;  %5600 = vmatpush3.msra.mxu1 %v5768_v34  ;;  %v4386_v34 = vld [vmem:[%s6327_s2] sm:$0xff]  ;;  %v4427_v35 = vand.u32 4294901760, %v4398_v32  ;;  %s5677_s2 = scalar_lea.vmem %s4881_s8, 32 }
 0x691   :  { %5572 = vmatprep.subr.mxu0 %v5699_v41  ;;  %5602 = vmatmul.mubr.f32.vlgmr.msra.gmra.mxu1 %v3981_v5  ;;  %p5678_p0 = scmp.ne.s32.totalorder %s4881_s8, %s5677_s2  ;;  %p5683_p2 = scmp.lt.s32.totalorder %s5677_s2, %s5677_s2 }
 0x692   :  { %5573 = vmatpush3.msra.mxu0 %v5780_v37  ;;  %5574 = vmatprep.mubr.msk.f32.mxu0 %vm5700_vm3, %v5699_v41  ;;  %v6256_v37 = vand.u32 4294901760, %v4386_v34 }
 0x693   :  { %5575 = vmatmul.mubr.f32.vlgmr.msra.gmra.mxu0 %v3982_v26  ;;  %5586 = vmatprep.subr.mxu0 %v5699_v41  ;;  %p5684_p3 = por %p5683_p2, %p5682_p1 }
 0x694   :  { %5587 = vmatpush3.msra.mxu0 %v5776_v36  ;;  %5592 = vmatprep.mubr.msk.f32.mxu0 %vm5700_vm3, %v5699_v41  ;;  %v6254_v36 = vand.u32 4294901760, %v4387_v33  ;;  %v6264_v31 = vsub.f32 %v4386_v34, %v6256_v37 }
 0x695   :  { %5588 = vmatprep.subr.mxu0 %v5699_v41  ;;  %5613 = vmatprep.subr.mxu1 %v5699_v41  ;;  %p5685_p4 = pnand %p5684_p3, %p5678_p0 }
 0x696   :  { %5589 = vmatpush3.msra.mxu0 %v5785_v38  ;;  %5619 = vmatprep.mubr.msk.f32.mxu1 %vm5700_vm3, %v5699_v41  ;;  %v6258_v38 = vsub.f32 %v4398_v32, %v4427_v35  ;;  %v4521_v10 = vand.u32 4294901760, %v6264_v31 }
 0x697   :  { %5590 = vmatprep.subr.mxu0 %v5699_v41 }
 0x698   :  { %5591 = vmatpush3.msra.mxu0 %v5792_v40  ;;  %v6261_v40 = vsub.f32 %v4387_v33, %v6254_v36  ;;  %v4507_v8 = vand.u32 4294901760, %v6258_v38  ;;  %v4522_v13 = vsub.f32 %v6264_v31, %v4521_v10 }
 0x699   :  { %5593 = vmatmul.mubr.f32.vlgmr.msra.gmra.mxu0 %v3981_v5  ;;  %5604 = vmatprep.subr.mxu0 %v5699_v41 }
 0x69a   :  { %5610 = vmatprep.mubr.msk.f32.mxu0 %vm5700_vm3, %v5699_v41  ;;  %5605 = vmatpush3.msra.mxu0 %v4427_v35  ;;  %v4514_v9 = vand.u32 4294901760, %v6261_v40  ;;  %v4508_v11 = vsub.f32 %v6258_v38, %v4507_v8  ;;  %v4523_v16 = vand.u32 4294901760, %v4522_v13 }
 0x69b   :  { %5606 = vmatprep.subr.mxu0 %v5699_v41 }
 0x69c   :  { %5607 = vmatpush3.msra.mxu0 %v6254_v36  ;;  %v4515_v12 = vsub.f32 %v6261_v40, %v4514_v9  ;;  %v4509_v14 = vand.u32 4294901760, %v4508_v11 }
 0x69d   :  { %5608 = vmatprep.subr.mxu0 %v5699_v41 }
 0x69e   :  { %5609 = vmatpush3.msra.mxu0 %v6256_v37  ;;  %v4516_v15 = vand.u32 4294901760, %v4515_v12  ;;  %5614 = vmatpush3.msra.mxu1 %v4509_v14 }
 0x69f   :  { %5622 = vmatprep.subr.mxu0 %v5699_v41  ;;  %5615 = vmatprep.subr.mxu1 %v5699_v41 }
 0x6a0   :  { %5616 = vmatpush3.msra.mxu1 %v4516_v15 }
 0x6a1   :  { %5617 = vmatprep.subr.mxu1 %v5699_v41 }
 0x6a2   :  { %5618 = vmatpush3.msra.mxu1 %v4523_v16 }
 0x6a3   :  { %5631 = vmatprep.subr.mxu1 %v5699_v41 }
 0x745   :  { %v4073_v17 = vpop.f32.mrf.mxu1 }
 0x747   :  { %v5567_v18 = vpop.f32.mrf.mxu1 }
 0x74b   :  { %v4227_v19 = vpop.f32.mrf.mxu1 }
 0x74d   :  { %v5585_v20 = vpop.f32.mrf.mxu1  ;;  %v3987_v21 = vpop.f32.mrf.mxu0 }
 0x74e   :  { %v3988_v22 = vadd.f32 %v3987_v21, %v5905_v44 }
 0x74f   :  { %v5558_v23 = vpop.f32.mrf.mxu0 }
 0x750   :  { %v4074_v24 = vadd.f32 %v4073_v17, %v3988_v22 }
 0x751   :  { %v4381_v29 = vpop.f32.mrf.mxu1 }
 0x753   :  { %v4151_v25 = vpop.f32.mrf.mxu0  ;;  %v5603_v30 = vpop.f32.mrf.mxu1 }
 0x754   :  { %v4152_v47 = vadd.f32 %v4151_v25, %v4074_v24 }
 0x755   :  { %v5576_v48 = vpop.f32.mrf.mxu0 }
 0x756   :  { %v4228_v27 = vadd.f32 %v4227_v19, %v4152_v47 }
 0x759   :  { %v4307_v49 = vpop.f32.mrf.mxu0 }
 0x75a   :  { %v4308_v39 = vadd.f32 %v4307_v49, %v4228_v27 }
 0x75b   :  { %v5594_v50 = vpop.f32.mrf.mxu0 }
 0x75c   :  { %v4382_v51 = vadd.f32 %v4381_v29, %v4308_v39 }
 0x75e   :  { %5675 = vtanh.f32 %v4382_v51 }
 0x76b   :  { %v5676_v43 = vpop.eup %5675 }
 0x76c   :  { %v4395_v45 = vsel %vm546_vm5, %v5676_v43, 0 }
 0x76d   :  { %v4468_v46 = vand.u32 4294901760, %v4395_v45 }
 0x76f   :  { %v4469_v52 = vsub.f32 %v4395_v45, %v4468_v46  ;;  %5620 = vmatmul.mubr.f32.vlgmr.msra.gmra.mxu1 %v4468_v46 }
 0x770   :  { %5632 = vmatpush3.msra.mxu1 %v4427_v35  ;;  %5637 = vmatprep.mubr.msk.f32.mxu1 %vm5700_vm3, %v5699_v41 }
 0x771   :  { %5633 = vmatprep.subr.mxu1 %v5699_v41  ;;  %v4470_v44 = vand.u32 4294901760, %v4469_v52 }
 0x772   :  { %5634 = vmatpush3.msra.mxu1 %v6254_v36 }
 0x773   :  { %5635 = vmatprep.subr.mxu1 %v5699_v41  ;;  %v4471_v53 = vsub.f32 %v4469_v52, %v4470_v44 }
 0x774   :  { %5636 = vmatpush3.msra.mxu1 %v6256_v37 }
 0x775   :  { %5638 = vmatmul.mubr.f32.vlgmr.msra.gmra.mxu1 %v4470_v44  ;;  %5649 = vmatprep.subr.mxu1 %v5699_v41  ;;  %v4472_v54 = vand.u32 4294901760, %v4471_v53 }
 0x776   :  { %5650 = vmatpush3.msra.mxu1 %v4427_v35  ;;  %5655 = vmatprep.mubr.msk.f32.mxu1 %vm5700_vm3, %v5699_v41 }
 0x777   :  { %5651 = vmatprep.subr.mxu1 %v5699_v41  ;;  %5611 = vmatmul.mubr.f32.vlgmr.msra.gmra.mxu0 %v4472_v54 }
 0x778   :  { %5623 = vmatpush3.msra.mxu0 %v6258_v38  ;;  %5652 = vmatpush3.msra.mxu1 %v6254_v36 }
 0x779   :  { %5624 = vmatprep.subr.mxu0 %v5699_v41  ;;  %5653 = vmatprep.subr.mxu1 %v5699_v41 }
 0x77a   :  { %5625 = vmatpush3.msra.mxu0 %v6261_v40  ;;  %5654 = vmatpush3.msra.mxu1 %v6256_v37 }
 0x77b   :  { %5626 = vmatprep.subr.mxu0 %v5699_v41  ;;  %5656 = vmatmul.mubr.f32.vlgmr.msra.gmra.mxu1 %v4468_v46 }
 0x77c   :  { %5627 = vmatpush3.msra.mxu0 %v6264_v31  ;;  %5628 = vmatprep.mubr.msk.f32.mxu0 %vm5700_vm3, %v5699_v41 }
 0x77d   :  { %5629 = vmatmul.mubr.f32.vlgmr.msra.gmra.mxu0 %v4469_v52  ;;  %5640 = vmatprep.subr.mxu0 %v5699_v41 }
 0x77e   :  { %5641 = vmatpush3.msra.mxu0 %v4507_v8  ;;  %5646 = vmatprep.mubr.msk.f32.mxu0 %vm5700_vm3, %v5699_v41 }
 0x77f   :  { %5642 = vmatprep.subr.mxu0 %v5699_v41 }
 0x780   :  { %5643 = vmatpush3.msra.mxu0 %v4514_v9 }
 0x781   :  { %5644 = vmatprep.subr.mxu0 %v5699_v41 }
 0x782   :  { %5645 = vmatpush3.msra.mxu0 %v4521_v10 }
 0x783   :  { %5647 = vmatmul.mubr.f32.vlgmr.msra.gmra.mxu0 %v4468_v46 }
 0x82f   :  { %v4560_v55 = vpop.f32.mrf.mxu1 }
 0x831   :  { %v5621_v56 = vpop.f32.mrf.mxu1 }
 0x835   :  { %v4714_v57 = vpop.f32.mrf.mxu1 }
 0x837   :  { %v5639_v59 = vpop.f32.mrf.mxu1  ;;  %v4474_v60 = vpop.f32.mrf.mxu0 }
 0x838   :  { %v4475_v61 = vadd.f32 %v4889_v58, %v4474_v60 }
 0x839   :  { %v5612_v62 = vpop.f32.mrf.mxu0 }
 0x83a   :  { %v4561_v63 = vadd.f32 %v4560_v55, %v4475_v61 }
 0x83b   :  { %v4868_v0 = vpop.f32.mrf.mxu1 }
 0x83d   :  { %v4638_v1 = vpop.f32.mrf.mxu0  ;;  %v5657_v2 = vpop.f32.mrf.mxu1 }
 0x83e   :  { %v4639_v41 = vadd.f32 %v4638_v1, %v4561_v63 }
 0x83f   :  { %v5630_v3 = vpop.f32.mrf.mxu0 }
 0x840   :  { %v4715_v4 = vadd.f32 %v4714_v57, %v4639_v41 }
 0x843   :  { %v4794_v5 = vpop.f32.mrf.mxu0 }
 0x844   :  { %v4795_v26 = vadd.f32 %v4794_v5, %v4715_v4 }
 0x845   :  { %v5648_v42 = vpop.f32.mrf.mxu0 }
 0x846   :  { %v4869_v6 = vadd.f32 %v4868_v0, %v4795_v26 }
 0x848   :  { %4873 = vst.msk [vmem:[#allocation2] sm:$0x3] %vm4872_vm6, %v4869_v6 }
 0x849   :  { %5688 = shalt.err (!%p5685_p4)
}
 0x84a   :  { %4883 = dma.vmem_to_hbm [thread:$0]  %s4881_s8, 32, %s6328_s3, [#allocation3]  }
 0x84b   :  { %5697 = dma.done.wait [#allocation3], 32  }
 0x84c   :  { %5698 = vsyncadd [#allocation3], 4294967264 }
 0x84d   :  { %4887 = vsyncpa [#allocation3], 1 }

</bundles_post_ra>
